<compile_context>
chip_gen: v6e
topology: v6e:2x2x1
jax: 0.10.0
libtpu: 0.0.40
codegen_flags: <defaults>
</compile_context>

<pallas_src>
import math

import jax
import jax.numpy as jnp
from jax.experimental import pallas as pl
from jax.experimental.pallas import tpu as pltpu

# ---------------------------------------------------------------------------
# Module hyper-parameters (small, consistent with the constructor args).
# ---------------------------------------------------------------------------
B, S = 2, 8        # batch, sequence length
D = 32             # embed_dim
H = 2              # n_head
K = 16             # k_dim
V = 16             # v_dim
HV = H * V         # concat-head width == out-proj input width
W_HEAD = 2 * K + V # per-head packed projection width: [q_h | k_h | v_h]
QKV = H * W_HEAD   # total packed qkv projection width


# ---------------------------------------------------------------------------
# Fused Pallas kernel
# ---------------------------------------------------------------------------
def _mhsa_kernel(h_ref, mask_ref, wqkv_ref, bqkv_ref, wo_ref, bo_ref,
                 o_ref, a_ref):
    """Fused QKV projection + masked attention + output projection.

    h_ref:    [B*S, D]     bf16 activations, batch folded into sublane rows
    mask_ref: [B, S]       float attention mask (1 keep / 0 pad)
    wqkv_ref: [D, QKV]     bf16, per-head packed [q_h | k_h | v_h]
    bqkv_ref: [1, QKV]     f32 packed biases (same per-head layout)
    wo_ref:   [HV, D] bf16, bo_ref: [1, D] f32
    o_ref:    [B*S, D]     f32 output projection result
    a_ref:    [B*H*S, S]   f32 attention probabilities (b-major, head-minor)
    """
    scale = 1.0 / math.sqrt(K)

    # One packed projection matmul: bf16 x bf16 -> f32 accumulation.
    qkv = jnp.dot(h_ref[...], wqkv_ref[...],
                  preferred_element_type=jnp.float32) + bqkv_ref[...]

    mask = mask_ref[...]                                       # [B, S] f32

    a_tiles = []       # B*H tiles of [S, S], b-major / head-minor order
    ctx_rows = []      # B tiles of [S, HV]
    for b in range(B):                    # static loop; B*H = 4 tiny tiles
        rows = slice(b * S, (b + 1) * S)
        m = mask[b:b + 1, :]              # [1, S]
        ctx_heads = []
        for hd in range(H):
            base = hd * W_HEAD            # contiguous per-head window
            qh = qkv[rows, base:base + K]                      # [S, K] f32
            kh = qkv[rows, base + K:base + 2 * K]              # [S, K] f32
            vh = qkv[rows, base + 2 * K:base + W_HEAD]         # [S, V] f32

            # q @ k^T via dot_general contracting last axes (no transpose op),
            # bf16 operands / f32 accumulation on the MXU.
            s = jax.lax.dot_general(
                qh.astype(jnp.bfloat16), kh.astype(jnp.bfloat16),
                (((1,), (1,)), ((), ())),
                preferred_element_type=jnp.float32) * scale    # [S, S] f32

            # masked_softmax exactly as the PyTorch spec (multiplicative mask);
            # elementwise math stays f32, divide goes to the EUP.
            ms = s * m
            mx = jnp.max(ms, axis=-1, keepdims=True)
            e = jnp.exp(ms - mx) * m
            den = jnp.sum(e, axis=-1, keepdims=True)
            den = jnp.where(den == 0.0, 1.0, den)              # all-pad rows -> 0
            a = e * pl.reciprocal(den, approx=True)            # [S, S] f32

            a_tiles.append(a)
            ctx_heads.append(jnp.dot(a.astype(jnp.bfloat16),
                                     vh.astype(jnp.bfloat16),
                                     preferred_element_type=jnp.float32))
        ctx_rows.append(jnp.concatenate(ctx_heads, axis=1))    # [S, HV]

    # Single full-block store of the attention output.
    a_ref[...] = jnp.concatenate(a_tiles, axis=0)              # [B*H*S, S]

    # Output projection on the register-resident concatenated contexts.
    ctx = jnp.concatenate(ctx_rows, axis=0)                    # [B*S, HV]
    o_ref[...] = jnp.dot(ctx.astype(jnp.bfloat16), wo_ref[...],
                         preferred_element_type=jnp.float32) + bo_ref[...]


# ---------------------------------------------------------------------------
# Wrapper
# ---------------------------------------------------------------------------
@jax.jit
def mhsa_forward(packed, h, attention_mask):
    b, s, d = h.shape
    h2 = h.reshape(b * s, d).astype(jnp.bfloat16)   # fold batch, bf16 MXU feed
    mask2 = attention_mask.astype(jnp.float32)      # [B, S]

    o2, a2 = pl.pallas_call(
        _mhsa_kernel,
        out_shape=(
            jax.ShapeDtypeStruct((b * s, d), jnp.float32),
            jax.ShapeDtypeStruct((b * H * s, s), jnp.float32),
        ),
        grid=(1,),
        in_specs=[
            pl.BlockSpec((b * s, d), lambda i: (0, 0)),
            pl.BlockSpec((b, s), lambda i: (0, 0)),
            pl.BlockSpec((d, QKV), lambda i: (0, 0)),
            pl.BlockSpec((1, QKV), lambda i: (0, 0)),
            pl.BlockSpec((HV, d), lambda i: (0, 0)),
            pl.BlockSpec((1, d), lambda i: (0, 0)),
        ],
        out_specs=(
            pl.BlockSpec((b * s, d), lambda i: (0, 0)),
            pl.BlockSpec((b * H * s, s), lambda i: (0, 0)),
        ),
        compiler_params=pltpu.CompilerParams(
            dimension_semantics=("arbitrary",)),
    )(h2, mask2, packed["w_qkv"], packed["b_qkv"], packed["wo"], packed["bo"])

    return o2.reshape(b, s, d), a2.reshape(b, H, s, s)


# ---------------------------------------------------------------------------
# Parameters: plain layout for the reference, per-head packed (bf16) for the
# kernel.
# ---------------------------------------------------------------------------
def init_params(key):
    ks = jax.random.split(key, 8)
    sc = 0.1
    f32 = jnp.float32
    return {
        "wq": (jax.random.normal(ks[0], (D, H * K)) * sc).astype(f32),
        "wk": (jax.random.normal(ks[1], (D, H * K)) * sc).astype(f32),
        "wv": (jax.random.normal(ks[2], (D, H * V)) * sc).astype(f32),
        "wo": (jax.random.normal(ks[3], (HV, D)) * sc).astype(f32),
        "bq": (jax.random.normal(ks[4], (1, H * K)) * sc).astype(f32),
        "bk": (jax.random.normal(ks[5], (1, H * K)) * sc).astype(f32),
        "bv": (jax.random.normal(ks[6], (1, H * V)) * sc).astype(f32),
        "bo": (jax.random.normal(ks[7], (1, D)) * sc).astype(f32),
    }


def pack_params(p):
    """Per-head contiguous packing: [q_0|k_0|v_0 | q_1|k_1|v_1 | ...]."""
    w_parts, b_parts = [], []
    for hd in range(H):
        w_parts += [p["wq"][:, hd * K:(hd + 1) * K],
                    p["wk"][:, hd * K:(hd + 1) * K],
                    p["wv"][:, hd * V:(hd + 1) * V]]
        b_parts += [p["bq"][:, hd * K:(hd + 1) * K],
                    p["bk"][:, hd * K:(hd + 1) * K],
                    p["bv"][:, hd * V:(hd + 1) * V]]
    return {
        "w_qkv": jnp.concatenate(w_parts, axis=1).astype(jnp.bfloat16),  # [D, QKV]
        "b_qkv": jnp.concatenate(b_parts, axis=1).astype(jnp.float32),   # [1, QKV]
        "wo": p["wo"].astype(jnp.bfloat16),                              # [HV, D]
        "bo": p["bo"].astype(jnp.float32),                               # [1, D]
    }


# ---------------------------------------------------------------------------
# Pure-JAX f32 "gold" reference (HIGHEST precision matmuls)
# ---------------------------------------------------------------------------
def masked_softmax_ref(vec, mask, axis):
    mask = mask.astype(jnp.float32)
    masked_vec = vec * mask
    max_vec = jnp.max(masked_vec, axis=axis, keepdims=True)
    exps = jnp.exp(masked_vec - max_vec)
    masked_exps = exps * mask
    masked_sums = jnp.sum(masked_exps, axis=axis, keepdims=True)
    masked_sums = masked_sums + (masked_sums == 0).astype(jnp.float32)
    return masked_exps / masked_sums


def mhsa_reference(p, h, attention_mask):
    hp = jax.lax.Precision.HIGHEST
    q = (jnp.dot(h, p["wq"], precision=hp) + p["bq"]
         ).reshape(B, S, H, K).transpose(0, 2, 1, 3)            # [B,H,S,K]
    k = (jnp.dot(h, p["wk"], precision=hp) + p["bk"]
         ).reshape(B, S, H, K).transpose(0, 2, 3, 1)            # [B,H,K,S]
    v = (jnp.dot(h, p["wv"], precision=hp) + p["bv"]
         ).reshape(B, S, H, V).transpose(0, 2, 1, 3)            # [B,H,S,V]
    a = jnp.matmul(q, k, precision=hp) / math.sqrt(K)
    a = masked_softmax_ref(a, attention_mask[:, None, None, :], axis=3)
    o = jnp.matmul(a, v, precision=hp).transpose(0, 2, 1, 3).reshape(B, S, HV)
    o = jnp.dot(o, p["wo"], precision=hp) + p["bo"]
    return o, a


# ---------------------------------------------------------------------------
if __name__ == "__main__":
    key = jax.random.PRNGKey(0)
    k_param, k_h = jax.random.split(key)

    params = init_params(k_param)
    packed = pack_params(params)
    h = (jax.random.normal(k_h, (B, S, D)) * 0.5).astype(jnp.float32)
    attention_mask = jnp.array(
        [[1, 1, 1, 1, 1, 1, 1, 1],
         [1, 1, 1, 1, 1, 0, 0, 0]], dtype=jnp.float32)

    o, a = mhsa_forward(packed, h, attention_mask)
    o = jax.block_until_ready(o)
    a = jax.block_until_ready(a)

    o_exp, a_exp = mhsa_reference(params, h, attention_mask)
    assert o.shape == (B, S, D) and a.shape == (B, H, S, S)
    # Kernel uses bf16 MXU operands (f32 accumulation) + approx reciprocal, so
    # compare against the f32 HIGHEST-precision reference at a bf16-appropriate
    # tolerance.
    assert jnp.allclose(o, o_exp, atol=2e-2, rtol=2e-2), "output mismatch"
    assert jnp.allclose(a, a_exp, atol=2e-2, rtol=2e-2), "attention mismatch"

    print("KERNEL_OK")
</pallas_src>

<mosaic_0001>
module attributes {stable_mosaic.version = 11 : i64} {
  func.func @_mhsa_kernel(%arg0: i32, %arg1: memref<16x32xbf16, #tpu.memory_space<vmem>>, %arg2: memref<2x8xf32, #tpu.memory_space<vmem>>, %arg3: memref<32x96xbf16, #tpu.memory_space<vmem>>, %arg4: memref<1x96xf32, #tpu.memory_space<vmem>>, %arg5: memref<32x32xbf16, #tpu.memory_space<vmem>>, %arg6: memref<1x32xf32, #tpu.memory_space<vmem>>, %arg7: memref<16x32xf32, #tpu.memory_space<vmem>>, %arg8: memref<32x8xf32, #tpu.memory_space<vmem>>) attributes {dimension_semantics = [#tpu.dimension_semantics<arbitrary>], iteration_bounds = array<i64: 1>, scalar_prefetch = 0 : i64, scratch_operands = 0 : i64, tpu.core_type = #tpu.core_type<tc>, window_params = [{pipeline_mode = #tpu.pipeline_mode<synchronous>, transform_indices = @transform_0, window_bounds = array<i64: 16, 32>}, {pipeline_mode = #tpu.pipeline_mode<synchronous>, transform_indices = @transform_1, window_bounds = array<i64: 2, 8>}, {pipeline_mode = #tpu.pipeline_mode<synchronous>, transform_indices = @transform_2, window_bounds = array<i64: 32, 96>}, {pipeline_mode = #tpu.pipeline_mode<synchronous>, transform_indices = @transform_3, window_bounds = array<i64: 1, 96>}, {pipeline_mode = #tpu.pipeline_mode<synchronous>, transform_indices = @transform_4, window_bounds = array<i64: 32, 32>}, {pipeline_mode = #tpu.pipeline_mode<synchronous>, transform_indices = @transform_5, window_bounds = array<i64: 1, 32>}, {pipeline_mode = #tpu.pipeline_mode<synchronous>, transform_indices = @transform_6, window_bounds = array<i64: 16, 32>}, {pipeline_mode = #tpu.pipeline_mode<synchronous>, transform_indices = @transform_7, window_bounds = array<i64: 32, 8>}]} {
    %c0 = arith.constant 0 : index
    %c0_0 = arith.constant 0 : index
    %0 = vector.load %arg1[%c0, %c0_0] : memref<16x32xbf16, #tpu.memory_space<vmem>>, vector<16x32xbf16>
    %c0_1 = arith.constant 0 : index
    %c0_2 = arith.constant 0 : index
    %1 = vector.load %arg3[%c0_1, %c0_2] : memref<32x96xbf16, #tpu.memory_space<vmem>>, vector<32x96xbf16>
    %cst = arith.constant dense<0.000000e+00> : vector<16x96xf32>
    %2 = tpu.matmul %0, %1, %cst {dimension_numbers = #tpu.dot_dimension_numbers<[1], [0], [0], [1], [0, 0, 1, 1], [], []>} : vector<16x32xbf16>, vector<32x96xbf16>, vector<16x96xf32> -> vector<16x96xf32>
    %c0_3 = arith.constant 0 : index
    %c0_4 = arith.constant 0 : index
    %3 = vector.load %arg4[%c0_3, %c0_4] : memref<1x96xf32, #tpu.memory_space<vmem>>, vector<1x96xf32>
    %4 = vector.broadcast %3 : vector<1x96xf32> to vector<16x96xf32>
    %5 = arith.addf %2, %4 : vector<16x96xf32>
    %c0_5 = arith.constant 0 : index
    %c0_6 = arith.constant 0 : index
    %6 = vector.load %arg2[%c0_5, %c0_6] : memref<2x8xf32, #tpu.memory_space<vmem>>, vector<2x8xf32>
    %7 = vector.extract_strided_slice %6 {offsets = [0, 0], sizes = [1, 8], strides = [1, 1]} : vector<2x8xf32> to vector<1x8xf32>
    %8 = vector.extract_strided_slice %5 {offsets = [0, 0], sizes = [8, 16], strides = [1, 1]} : vector<16x96xf32> to vector<8x16xf32>
    %9 = vector.extract_strided_slice %5 {offsets = [0, 16], sizes = [8, 16], strides = [1, 1]} : vector<16x96xf32> to vector<8x16xf32>
    %10 = vector.extract_strided_slice %5 {offsets = [0, 32], sizes = [8, 16], strides = [1, 1]} : vector<16x96xf32> to vector<8x16xf32>
    %11 = arith.truncf %8 : vector<8x16xf32> to vector<8x16xbf16>
    %12 = arith.truncf %9 : vector<8x16xf32> to vector<8x16xbf16>
    %cst_7 = arith.constant dense<0.000000e+00> : vector<8x8xf32>
    %13 = tpu.matmul %11, %12, %cst_7 {dimension_numbers = #tpu.dot_dimension_numbers<[1], [1], [0], [0], [0, 0, 1, 0], [], []>} : vector<8x16xbf16>, vector<8x16xbf16>, vector<8x8xf32> -> vector<8x8xf32>
    %cst_8 = arith.constant 2.500000e-01 : f32
    %14 = vector.broadcast %cst_8 : f32 to vector<8x8xf32>
    %15 = arith.mulf %13, %14 : vector<8x8xf32>
    %16 = vector.broadcast %7 : vector<1x8xf32> to vector<8x8xf32>
    %17 = arith.mulf %15, %16 : vector<8x8xf32>
    %cst_9 = arith.constant dense<0xFF800000> : vector<8xf32>
    %18 = vector.multi_reduction <maximumf>, %17, %cst_9 [1] : vector<8x8xf32> to vector<8xf32>
    %19 = vector.shape_cast %18 : vector<8xf32> to vector<8x1xf32>
    %20 = vector.broadcast %19 : vector<8x1xf32> to vector<8x8xf32>
    %21 = arith.subf %17, %20 : vector<8x8xf32>
    %22 = math.exp %21 : vector<8x8xf32>
    %23 = vector.broadcast %7 : vector<1x8xf32> to vector<8x8xf32>
    %24 = arith.mulf %22, %23 : vector<8x8xf32>
    %cst_10 = arith.constant dense<0.000000e+00> : vector<8xf32>
    %25 = vector.multi_reduction <add>, %24, %cst_10 [1] : vector<8x8xf32> to vector<8xf32>
    %26 = vector.shape_cast %25 : vector<8xf32> to vector<8x1xf32>
    %cst_11 = arith.constant 0.000000e+00 : f32
    %27 = vector.broadcast %cst_11 : f32 to vector<8x1xf32>
    %28 = arith.cmpf oeq, %26, %27 : vector<8x1xf32>
    %cst_12 = arith.constant 1.000000e+00 : f32
    %29 = vector.broadcast %cst_12 : f32 to vector<8x1xf32>
    %30 = arith.select %28, %29, %26 : vector<8x1xi1>, vector<8x1xf32>
    %31 = tpu.reciprocal %30 {approx = true} : vector<8x1xf32> -> vector<8x1xf32>
    %32 = vector.broadcast %31 : vector<8x1xf32> to vector<8x8xf32>
    %33 = arith.mulf %24, %32 : vector<8x8xf32>
    %34 = arith.truncf %33 : vector<8x8xf32> to vector<8x8xbf16>
    %35 = arith.truncf %10 : vector<8x16xf32> to vector<8x16xbf16>
    %cst_13 = arith.constant dense<0.000000e+00> : vector<8x16xf32>
    %36 = tpu.matmul %34, %35, %cst_13 {dimension_numbers = #tpu.dot_dimension_numbers<[1], [0], [0], [1], [0, 0, 1, 1], [], []>} : vector<8x8xbf16>, vector<8x16xbf16>, vector<8x16xf32> -> vector<8x16xf32>
    %37 = vector.extract_strided_slice %5 {offsets = [0, 48], sizes = [8, 16], strides = [1, 1]} : vector<16x96xf32> to vector<8x16xf32>
    %38 = vector.extract_strided_slice %5 {offsets = [0, 64], sizes = [8, 16], strides = [1, 1]} : vector<16x96xf32> to vector<8x16xf32>
    %39 = vector.extract_strided_slice %5 {offsets = [0, 80], sizes = [8, 16], strides = [1, 1]} : vector<16x96xf32> to vector<8x16xf32>
    %40 = arith.truncf %37 : vector<8x16xf32> to vector<8x16xbf16>
    %41 = arith.truncf %38 : vector<8x16xf32> to vector<8x16xbf16>
    %cst_14 = arith.constant dense<0.000000e+00> : vector<8x8xf32>
    %42 = tpu.matmul %40, %41, %cst_14 {dimension_numbers = #tpu.dot_dimension_numbers<[1], [1], [0], [0], [0, 0, 1, 0], [], []>} : vector<8x16xbf16>, vector<8x16xbf16>, vector<8x8xf32> -> vector<8x8xf32>
    %cst_15 = arith.constant 2.500000e-01 : f32
    %43 = vector.broadcast %cst_15 : f32 to vector<8x8xf32>
    %44 = arith.mulf %42, %43 : vector<8x8xf32>
    %45 = vector.broadcast %7 : vector<1x8xf32> to vector<8x8xf32>
    %46 = arith.mulf %44, %45 : vector<8x8xf32>
    %cst_16 = arith.constant dense<0xFF800000> : vector<8xf32>
    %47 = vector.multi_reduction <maximumf>, %46, %cst_16 [1] : vector<8x8xf32> to vector<8xf32>
    %48 = vector.shape_cast %47 : vector<8xf32> to vector<8x1xf32>
    %49 = vector.broadcast %48 : vector<8x1xf32> to vector<8x8xf32>
    %50 = arith.subf %46, %49 : vector<8x8xf32>
    %51 = math.exp %50 : vector<8x8xf32>
    %52 = vector.broadcast %7 : vector<1x8xf32> to vector<8x8xf32>
    %53 = arith.mulf %51, %52 : vector<8x8xf32>
    %cst_17 = arith.constant dense<0.000000e+00> : vector<8xf32>
    %54 = vector.multi_reduction <add>, %53, %cst_17 [1] : vector<8x8xf32> to vector<8xf32>
    %55 = vector.shape_cast %54 : vector<8xf32> to vector<8x1xf32>
    %cst_18 = arith.constant 0.000000e+00 : f32
    %56 = vector.broadcast %cst_18 : f32 to vector<8x1xf32>
    %57 = arith.cmpf oeq, %55, %56 : vector<8x1xf32>
    %cst_19 = arith.constant 1.000000e+00 : f32
    %58 = vector.broadcast %cst_19 : f32 to vector<8x1xf32>
    %59 = arith.select %57, %58, %55 : vector<8x1xi1>, vector<8x1xf32>
    %60 = tpu.reciprocal %59 {approx = true} : vector<8x1xf32> -> vector<8x1xf32>
    %61 = vector.broadcast %60 : vector<8x1xf32> to vector<8x8xf32>
    %62 = arith.mulf %53, %61 : vector<8x8xf32>
    %63 = arith.truncf %62 : vector<8x8xf32> to vector<8x8xbf16>
    %64 = arith.truncf %39 : vector<8x16xf32> to vector<8x16xbf16>
    %cst_20 = arith.constant dense<0.000000e+00> : vector<8x16xf32>
    %65 = tpu.matmul %63, %64, %cst_20 {dimension_numbers = #tpu.dot_dimension_numbers<[1], [0], [0], [1], [0, 0, 1, 1], [], []>} : vector<8x8xbf16>, vector<8x16xbf16>, vector<8x16xf32> -> vector<8x16xf32>
    %66 = tpu.concatenate %36, %65 in 1 : vector<8x16xf32>, vector<8x16xf32> -> vector<8x32xf32>
    %67 = vector.extract_strided_slice %6 {offsets = [1, 0], sizes = [1, 8], strides = [1, 1]} : vector<2x8xf32> to vector<1x8xf32>
    %68 = vector.extract_strided_slice %5 {offsets = [8, 0], sizes = [8, 16], strides = [1, 1]} : vector<16x96xf32> to vector<8x16xf32>
    %69 = vector.extract_strided_slice %5 {offsets = [8, 16], sizes = [8, 16], strides = [1, 1]} : vector<16x96xf32> to vector<8x16xf32>
    %70 = vector.extract_strided_slice %5 {offsets = [8, 32], sizes = [8, 16], strides = [1, 1]} : vector<16x96xf32> to vector<8x16xf32>
    %71 = arith.truncf %68 : vector<8x16xf32> to vector<8x16xbf16>
    %72 = arith.truncf %69 : vector<8x16xf32> to vector<8x16xbf16>
    %cst_21 = arith.constant dense<0.000000e+00> : vector<8x8xf32>
    %73 = tpu.matmul %71, %72, %cst_21 {dimension_numbers = #tpu.dot_dimension_numbers<[1], [1], [0], [0], [0, 0, 1, 0], [], []>} : vector<8x16xbf16>, vector<8x16xbf16>, vector<8x8xf32> -> vector<8x8xf32>
    %cst_22 = arith.constant 2.500000e-01 : f32
    %74 = vector.broadcast %cst_22 : f32 to vector<8x8xf32>
    %75 = arith.mulf %73, %74 : vector<8x8xf32>
    %76 = vector.broadcast %67 : vector<1x8xf32> to vector<8x8xf32>
    %77 = arith.mulf %75, %76 : vector<8x8xf32>
    %cst_23 = arith.constant dense<0xFF800000> : vector<8xf32>
    %78 = vector.multi_reduction <maximumf>, %77, %cst_23 [1] : vector<8x8xf32> to vector<8xf32>
    %79 = vector.shape_cast %78 : vector<8xf32> to vector<8x1xf32>
    %80 = vector.broadcast %79 : vector<8x1xf32> to vector<8x8xf32>
    %81 = arith.subf %77, %80 : vector<8x8xf32>
    %82 = math.exp %81 : vector<8x8xf32>
    %83 = vector.broadcast %67 : vector<1x8xf32> to vector<8x8xf32>
    %84 = arith.mulf %82, %83 : vector<8x8xf32>
    %cst_24 = arith.constant dense<0.000000e+00> : vector<8xf32>
    %85 = vector.multi_reduction <add>, %84, %cst_24 [1] : vector<8x8xf32> to vector<8xf32>
    %86 = vector.shape_cast %85 : vector<8xf32> to vector<8x1xf32>
    %cst_25 = arith.constant 0.000000e+00 : f32
    %87 = vector.broadcast %cst_25 : f32 to vector<8x1xf32>
    %88 = arith.cmpf oeq, %86, %87 : vector<8x1xf32>
    %cst_26 = arith.constant 1.000000e+00 : f32
    %89 = vector.broadcast %cst_26 : f32 to vector<8x1xf32>
    %90 = arith.select %88, %89, %86 : vector<8x1xi1>, vector<8x1xf32>
    %91 = tpu.reciprocal %90 {approx = true} : vector<8x1xf32> -> vector<8x1xf32>
    %92 = vector.broadcast %91 : vector<8x1xf32> to vector<8x8xf32>
    %93 = arith.mulf %84, %92 : vector<8x8xf32>
    %94 = arith.truncf %93 : vector<8x8xf32> to vector<8x8xbf16>
    %95 = arith.truncf %70 : vector<8x16xf32> to vector<8x16xbf16>
    %cst_27 = arith.constant dense<0.000000e+00> : vector<8x16xf32>
    %96 = tpu.matmul %94, %95, %cst_27 {dimension_numbers = #tpu.dot_dimension_numbers<[1], [0], [0], [1], [0, 0, 1, 1], [], []>} : vector<8x8xbf16>, vector<8x16xbf16>, vector<8x16xf32> -> vector<8x16xf32>
    %97 = vector.extract_strided_slice %5 {offsets = [8, 48], sizes = [8, 16], strides = [1, 1]} : vector<16x96xf32> to vector<8x16xf32>
    %98 = vector.extract_strided_slice %5 {offsets = [8, 64], sizes = [8, 16], strides = [1, 1]} : vector<16x96xf32> to vector<8x16xf32>
    %99 = vector.extract_strided_slice %5 {offsets = [8, 80], sizes = [8, 16], strides = [1, 1]} : vector<16x96xf32> to vector<8x16xf32>
    %100 = arith.truncf %97 : vector<8x16xf32> to vector<8x16xbf16>
    %101 = arith.truncf %98 : vector<8x16xf32> to vector<8x16xbf16>
    %cst_28 = arith.constant dense<0.000000e+00> : vector<8x8xf32>
    %102 = tpu.matmul %100, %101, %cst_28 {dimension_numbers = #tpu.dot_dimension_numbers<[1], [1], [0], [0], [0, 0, 1, 0], [], []>} : vector<8x16xbf16>, vector<8x16xbf16>, vector<8x8xf32> -> vector<8x8xf32>
    %cst_29 = arith.constant 2.500000e-01 : f32
    %103 = vector.broadcast %cst_29 : f32 to vector<8x8xf32>
    %104 = arith.mulf %102, %103 : vector<8x8xf32>
    %105 = vector.broadcast %67 : vector<1x8xf32> to vector<8x8xf32>
    %106 = arith.mulf %104, %105 : vector<8x8xf32>
    %cst_30 = arith.constant dense<0xFF800000> : vector<8xf32>
    %107 = vector.multi_reduction <maximumf>, %106, %cst_30 [1] : vector<8x8xf32> to vector<8xf32>
    %108 = vector.shape_cast %107 : vector<8xf32> to vector<8x1xf32>
    %109 = vector.broadcast %108 : vector<8x1xf32> to vector<8x8xf32>
    %110 = arith.subf %106, %109 : vector<8x8xf32>
    %111 = math.exp %110 : vector<8x8xf32>
    %112 = vector.broadcast %67 : vector<1x8xf32> to vector<8x8xf32>
    %113 = arith.mulf %111, %112 : vector<8x8xf32>
    %cst_31 = arith.constant dense<0.000000e+00> : vector<8xf32>
    %114 = vector.multi_reduction <add>, %113, %cst_31 [1] : vector<8x8xf32> to vector<8xf32>
    %115 = vector.shape_cast %114 : vector<8xf32> to vector<8x1xf32>
    %cst_32 = arith.constant 0.000000e+00 : f32
    %116 = vector.broadcast %cst_32 : f32 to vector<8x1xf32>
    %117 = arith.cmpf oeq, %115, %116 : vector<8x1xf32>
    %cst_33 = arith.constant 1.000000e+00 : f32
    %118 = vector.broadcast %cst_33 : f32 to vector<8x1xf32>
    %119 = arith.select %117, %118, %115 : vector<8x1xi1>, vector<8x1xf32>
    %120 = tpu.reciprocal %119 {approx = true} : vector<8x1xf32> -> vector<8x1xf32>
    %121 = vector.broadcast %120 : vector<8x1xf32> to vector<8x8xf32>
    %122 = arith.mulf %113, %121 : vector<8x8xf32>
    %123 = arith.truncf %122 : vector<8x8xf32> to vector<8x8xbf16>
    %124 = arith.truncf %99 : vector<8x16xf32> to vector<8x16xbf16>
    %cst_34 = arith.constant dense<0.000000e+00> : vector<8x16xf32>
    %125 = tpu.matmul %123, %124, %cst_34 {dimension_numbers = #tpu.dot_dimension_numbers<[1], [0], [0], [1], [0, 0, 1, 1], [], []>} : vector<8x8xbf16>, vector<8x16xbf16>, vector<8x16xf32> -> vector<8x16xf32>
    %126 = tpu.concatenate %96, %125 in 1 : vector<8x16xf32>, vector<8x16xf32> -> vector<8x32xf32>
    %127 = tpu.concatenate %33, %62, %93, %122 in 0 : vector<8x8xf32>, vector<8x8xf32>, vector<8x8xf32>, vector<8x8xf32> -> vector<32x8xf32>
    %c0_35 = arith.constant 0 : index
    %c0_36 = arith.constant 0 : index
    %128 = vector.load %arg8[%c0_35, %c0_36] : memref<32x8xf32, #tpu.memory_space<vmem>>, vector<32x8xf32>
    tpu.vector_store %arg8[%c0_35, %c0_36], %127 {strides = array<i32>} : memref<32x8xf32, #tpu.memory_space<vmem>>, vector<32x8xf32>,
    %129 = tpu.concatenate %66, %126 in 0 : vector<8x32xf32>, vector<8x32xf32> -> vector<16x32xf32>
    %130 = arith.truncf %129 : vector<16x32xf32> to vector<16x32xbf16>
    %c0_37 = arith.constant 0 : index
    %c0_38 = arith.constant 0 : index
    %131 = vector.load %arg5[%c0_37, %c0_38] : memref<32x32xbf16, #tpu.memory_space<vmem>>, vector<32x32xbf16>
    %cst_39 = arith.constant dense<0.000000e+00> : vector<16x32xf32>
    %132 = tpu.matmul %130, %131, %cst_39 {dimension_numbers = #tpu.dot_dimension_numbers<[1], [0], [0], [1], [0, 0, 1, 1], [], []>} : vector<16x32xbf16>, vector<32x32xbf16>, vector<16x32xf32> -> vector<16x32xf32>
    %c0_40 = arith.constant 0 : index
    %c0_41 = arith.constant 0 : index
    %133 = vector.load %arg6[%c0_40, %c0_41] : memref<1x32xf32, #tpu.memory_space<vmem>>, vector<1x32xf32>
    %134 = vector.broadcast %133 : vector<1x32xf32> to vector<16x32xf32>
    %135 = arith.addf %132, %134 : vector<16x32xf32>
    %c0_42 = arith.constant 0 : index
    %c0_43 = arith.constant 0 : index
    %136 = vector.load %arg7[%c0_42, %c0_43] : memref<16x32xf32, #tpu.memory_space<vmem>>, vector<16x32xf32>
    tpu.vector_store %arg7[%c0_42, %c0_43], %135 {strides = array<i32>} : memref<16x32xf32, #tpu.memory_space<vmem>>, vector<16x32xf32>,
    return
  }
  func.func @transform_0(%arg0: i32) -> (i32, i32) {
    %c0_i32 = arith.constant 0 : i32
    %c0_i32_0 = arith.constant 0 : i32
    %c0_i32_1 = arith.constant 0 : i32
    return %c0_i32, %c0_i32_0 : i32, i32
  }
  func.func @transform_1(%arg0: i32) -> (i32, i32) {
    %c0_i32 = arith.constant 0 : i32
    %c0_i32_0 = arith.constant 0 : i32
    %c0_i32_1 = arith.constant 0 : i32
    return %c0_i32, %c0_i32_0 : i32, i32
  }
  func.func @transform_2(%arg0: i32) -> (i32, i32) {
    %c0_i32 = arith.constant 0 : i32
    %c0_i32_0 = arith.constant 0 : i32
    %c0_i32_1 = arith.constant 0 : i32
    return %c0_i32, %c0_i32_0 : i32, i32
  }
  func.func @transform_3(%arg0: i32) -> (i32, i32) {
    %c0_i32 = arith.constant 0 : i32
    %c0_i32_0 = arith.constant 0 : i32
    %c0_i32_1 = arith.constant 0 : i32
    return %c0_i32, %c0_i32_0 : i32, i32
  }
  func.func @transform_4(%arg0: i32) -> (i32, i32) {
    %c0_i32 = arith.constant 0 : i32
    %c0_i32_0 = arith.constant 0 : i32
    %c0_i32_1 = arith.constant 0 : i32
    return %c0_i32, %c0_i32_0 : i32, i32
  }
  func.func @transform_5(%arg0: i32) -> (i32, i32) {
    %c0_i32 = arith.constant 0 : i32
    %c0_i32_0 = arith.constant 0 : i32
    %c0_i32_1 = arith.constant 0 : i32
    return %c0_i32, %c0_i32_0 : i32, i32
  }
  func.func @transform_6(%arg0: i32) -> (i32, i32) {
    %c0_i32 = arith.constant 0 : i32
    %c0_i32_0 = arith.constant 0 : i32
    %c0_i32_1 = arith.constant 0 : i32
    return %c0_i32, %c0_i32_0 : i32, i32
  }
  func.func @transform_7(%arg0: i32) -> (i32, i32) {
    %c0_i32 = arith.constant 0 : i32
    %c0_i32_0 = arith.constant 0 : i32
    %c0_i32_1 = arith.constant 0 : i32
    return %c0_i32, %c0_i32_0 : i32, i32
  }
}

</mosaic_0001>

<bundles_post_ra>
// kernel: mhsa_forward.1
= control target key start
LH: loop header
LB: loop body
LE: loop exit
PB: predicated region body
PF: predicated region fallthrough
CT: control target
= control target key end

     0   :  { %13 = vsyncpa [#allocation3], 0  ;;  %s1082_s0 = inlined_call_operand.vmem [shape: bf16[16,32], index: 0, kind: input, shape index: {}]   ;;  %s1083_s1 = inlined_call_operand.vmem [shape: f32[2,8], index: 1, kind: input, shape index: {}]   ;;  %s1084_s2 = inlined_call_operand.vmem [shape: bf16[32,96], index: 2, kind: input, shape index: {}]   ;;  %s1085_s3 = inlined_call_operand.vmem [shape: f32[1,96], index: 3, kind: input, shape index: {}]   ;;  %s1086_s4 = inlined_call_operand.hbm [shape: bf16[32,32], index: 4, kind: input, shape index: {}]   ;;  %s1087_s5 = inlined_call_operand.vmem [shape: f32[1,32], index: 5, kind: input, shape index: {}]   ;;  %s1088_s6 = inlined_call_operand.hbm [shape: f32[16,32], index: 6, kind: output, shape index: {0}]   ;;  %s1089_s7 = inlined_call_operand.hbm [shape: f32[32,8], index: 7, kind: output, shape index: {1}]  }
   0x1   :  { %14 = vsyncpa [#allocation4], 0 }
   0x2   :  { %15 = vsyncpa [#allocation7], 0  ;;  %s915_s24 = smov [#allocation2]  }
   0x3   :  { %s29_s25 = sshll.u32 %s915_s24, 4  ;;  %s30_s25 = int_to_ptr.vmem [resolvable:$true] %s29_s25 }
   0x4   :  { %s857_s26 = scalar_lea.vmem %s30_s25, 256  ;;  %p862_p1 = scmp.lt.s32.totalorder %s30_s25, %s30_s25 }
   0x5   :  { %p858_p0 = scmp.ne.s32.totalorder %s30_s25, %s857_s26  ;;  %p863_p2 = scmp.lt.s32.totalorder %s857_s26, %s857_s26 }
   0x7   :  { %p864_p3 = por %p863_p2, %p862_p1 }
   0x9   :  { %p865_p4 = pnand %p864_p3, %p858_p0 }
   0xb   :  { %868 = shalt.err (!%p865_p4)
}
   0xc   :  { %s916_s27 = smov 64   ;;  %s917_s28 = smov 4  }
   0xd   :  { %35 = dma.hbm_to_vmem [thread:$0]  %s1086_s4, 256, %s30_s25, [#allocation3], %s916_s27, %s916_s27, %s917_s28  }
   0xe   :  { %909 = dma.done.wait [#allocation3], 256  }
   0xf   :  { %910 = vsyncadd [#allocation3], 4294967040  ;;  %v918_v0 = vmov 0.0   ;;  %vm919_vm0 = vmmov 0   ;;  %v828_v1 = vld [vmem:[%s1084_s2 + $0x8] sm:$0xff]   ;;  %v829_v2 = vld [vmem:[%s1084_s2] sm:$0xff]   ;;  %v170_v23 = vlaneseq }
  0x10   :  { %745 = vmatprep.subr.bf16.mxu0 %v918_v0  ;;  %749 = vmatprep.mubr.msk.bf16.mxu0 %vm919_vm0, %v918_v0  ;;  %v830_v3 = vld [vmem:[%s1082_s0] sm:$0xff]   ;;  %vm72_vm1 = vcmask 261120   ;;  %s920_s0 = smov 80   ;;  %s921_s2 = smov 112   ;;  %vm122_vm2 = vcmask 130048   ;;  %vm175_vm3 = vcmask 64512  }
  0x11   :  { %753 = vmatprep.subr.bf16.mxu1 %v918_v0  ;;  %755 = vmatprep.mubr.msk.bf16.mxu1 %vm919_vm0, %v918_v0  ;;  %v706_v4 = vld [vmem:[%s1085_s3] ss:$0 sm:$0xff]  ;;  %v171_v24 = vshrl.u32 %v170_v23, 7  ;;  %s923_s16 = smov 48   ;;  %vm196_vm5 = vcmask 1043456   ;;  %s924_s17 = smov 16  }
  0x12   :  { %746 = vmatpush3.bf16.msra.mxu0 %v828_v1  ;;  %v117_v26 = vld [vmem:[%s1083_s1] sm:$0x3]  ;;  %s922_s1 = smov 96   ;;  %s925_s18 = smov [#allocation6]  }
  0x13   :  { %747 = vmatprep.subr.bf16.mxu0 %v918_v0  ;;  %v172_v25 = vsub.s32 0, %v171_v24  ;;  %v413_v39 = vsub.s32 1, %v171_v24  ;;  %s690_s19 = sshll.u32 %s925_s18, 4  ;;  %s691_s19 = int_to_ptr.vmem [resolvable:$true] %s690_s19 }
  0x14   :  { %s869_s20 = scalar_lea.vmem %s691_s19, 512  ;;  %p874_p6 = scmp.lt.s32.totalorder %s691_s19, %s691_s19 }
  0x15   :  { %v173_v27 = vrot.slane %v117_v26, %v172_v25  ;;  %v414_v43 = vrot.slane %v117_v26, %v413_v39  ;;  %p870_p5 = scmp.ne.s32.totalorder %s691_s19, %s869_s20  ;;  %p875_p7 = scmp.lt.s32.totalorder %s869_s20, %s869_s20 }
  0x16   :  { %748 = vmatpush3.bf16.msra.mxu0 %v829_v2 }
  0x17   :  { %759 = vmatprep.subr.bf16.mxu0 %v918_v0  ;;  %p876_p8 = por %p875_p7, %p874_p6 }
  0x19   :  { %750 = vmatmul.mubr.msk.bf16.vlgmr.msra.gmra.mxu0 %vm72_vm1, %v830_v3  ;;  %p877_p9 = pnand %p876_p8, %p870_p5 }
  0x1a   :  { %761 = vmatprep.mubr.msk.bf16.mxu0 %vm919_vm0, %v918_v0 }
  0xd9   :  { %v110_v5 = vpop.f32.mrf.mxu0 }
  0xda   :  { %v111_v6 = vadd.f32 %v706_v4, %v110_v5 }
  0xdb   :  { %v751_v7 = vpop.f32.mrf.mxu0 }
  0xdc   :  { %v997_v8 = vpack.c.bf16 %v111_v6, %v111_v6 }
  0xdd   :  { %v113_v9 = vpop.f32.mrf.mxu0 }
  0xde   :  { %v114_v10 = vadd.f32 %v706_v4, %v113_v9  ;;  %240 = vrot.lane.b32.xlu1 %v997_v8, %s920_s0  ;;  %120 = vrot.lane.b32.xlu0 %v997_v8, %s921_s2 }
  0xdf   :  { %v752_v11 = vpop.f32.mrf.mxu0 }
  0xe0   :  { %v1001_v12 = vpack.c.bf16 %v114_v10, %v114_v10 }
  0xe2   :  { %242 = vrot.lane.b32.xlu0 %v997_v8, %s916_s27  ;;  %362 = vrot.lane.b32.xlu1 %v1001_v12, %s921_s2 }
  0xe6   :  { %481 = vrot.lane.b32.xlu0 %v1001_v12, %s916_s27  ;;  %479 = vrot.lane.b32.xlu1 %v1001_v12, %s920_s0 }
 0x150   :  { %v121_v13 = vpop.permute.xlu0 %120  ;;  %v241_v16 = vpop.permute.xlu1 %240 }
 0x151   :  { %v127_v14 = vsel %vm122_vm2, %v121_v13, 0 }
 0x152   :  { %754 = vmatpush3.bf16.xpose.msra.mxu1 %v127_v14 }
 0x153   :  { %765 = vmatprep.subr.bf16.mxu1 %v918_v0 }
 0x154   :  { %v243_v15 = vpop.permute.xlu0 %242  ;;  %v363_v18 = vpop.permute.xlu1 %362 }
 0x155   :  { %v248_v17 = vsel %vm122_vm2, %v243_v15, 0  ;;  %v368_v19 = vsel %vm122_vm2, %v363_v18, 0 }
 0x158   :  { %v482_v20 = vpop.permute.xlu0 %481  ;;  %v480_v22 = vpop.permute.xlu1 %479 }
 0x159   :  { %756 = vmatmul.mubr.msk.bf16.vlgmr.msra.gmra.mxu1 %vm122_vm2, %v997_v8  ;;  %v487_v21 = vsel %vm122_vm2, %v482_v20, 0 }
 0x15a   :  { %766 = vmatpush3.bf16.xpose.msra.mxu1 %v248_v17  ;;  %767 = vmatprep.mubr.msk.bf16.mxu1 %vm919_vm0, %v918_v0 }
 0x15b   :  { %777 = vmatprep.subr.bf16.mxu1 %v918_v0 }
 0x161   :  { %768 = vmatmul.mubr.msk.bf16.vlgmr.msra.gmra.mxu1 %vm122_vm2, %v241_v16 }
 0x162   :  { %778 = vmatpush3.bf16.xpose.msra.mxu1 %v368_v19  ;;  %779 = vmatprep.mubr.msk.bf16.mxu1 %vm919_vm0, %v918_v0 }
 0x163   :  { %789 = vmatprep.subr.bf16.mxu1 %v918_v0 }
 0x169   :  { %780 = vmatmul.mubr.msk.bf16.vlgmr.msra.gmra.mxu1 %vm122_vm2, %v1001_v12 }
 0x16a   :  { %790 = vmatpush3.bf16.xpose.msra.mxu1 %v487_v21  ;;  %791 = vmatprep.mubr.msk.bf16.mxu1 %vm919_vm0, %v918_v0 }
 0x16b   :  { %801 = vmatprep.subr.bf16.mxu1 %v918_v0 }
 0x171   :  { %792 = vmatmul.mubr.msk.bf16.vlgmr.msra.gmra.mxu1 %vm122_vm2, %v480_v22 }
 0x172   :  { %805 = vmatprep.mubr.msk.bf16.mxu1 %vm919_vm0, %v918_v0 }
 0x219   :  { %v163_v28 = vpop.f32.mrf.mxu1 }
 0x21a   :  { %v169_v29 = vmul.f32 0.25, %v163_v28 }
 0x21b   :  { %v757_v30 = vpop.f32.mrf.mxu1 }
 0x21c   :  { %v174_v31 = vmul.f32 %v173_v27, %v169_v29 }
 0x21d   :  { %v166_v32 = vpop.f32.mrf.mxu1 }
 0x21e   :  { %v176_v33 = vsel %vm175_vm3, %v174_v31, -inf }
 0x21f   :  { %v758_v34 = vpop.f32.mrf.mxu1  ;;  %177 = vmax.xlane.f32.xlu0 %v176_v33 }
 0x221   :  { %v284_v35 = vpop.f32.mrf.mxu1 }
 0x222   :  { %v290_v36 = vmul.f32 0.25, %v284_v35 }
 0x223   :  { %v769_v37 = vpop.f32.mrf.mxu1 }
 0x224   :  { %v291_v38 = vmul.f32 %v290_v36, %v173_v27 }
 0x225   :  { %v287_v40 = vpop.f32.mrf.mxu1 }
 0x226   :  { %v292_v41 = vsel %vm175_vm3, %v291_v38, -inf }
 0x227   :  { %v770_v42 = vpop.f32.mrf.mxu1  ;;  %293 = vmax.xlane.f32.xlu1 %v292_v41 }
 0x229   :  { %v404_v44 = vpop.f32.mrf.mxu1 }
 0x22a   :  { %v410_v45 = vmul.f32 0.25, %v404_v44 }
 0x22b   :  { %v781_v46 = vpop.f32.mrf.mxu1 }
 0x22c   :  { %v415_v47 = vmul.f32 %v414_v43, %v410_v45 }
 0x22d   :  { %v407_v48 = vpop.f32.mrf.mxu1 }
 0x22e   :  { %v416_v49 = vsel %vm175_vm3, %v415_v47, -inf }
 0x22f   :  { %417 = vmax.xlane.f32.xlu0 %v416_v49  ;;  %v782_v50 = vpop.f32.mrf.mxu1 }
 0x231   :  { %v523_v51 = vpop.f32.mrf.mxu1 }
 0x232   :  { %v529_v52 = vmul.f32 0.25, %v523_v51 }
 0x233   :  { %v793_v53 = vpop.f32.mrf.mxu1 }
 0x234   :  { %v530_v54 = vmul.f32 %v529_v52, %v414_v43 }
 0x235   :  { %v526_v55 = vpop.f32.mrf.mxu1 }
 0x236   :  { %v531_v56 = vsel %vm175_vm3, %v530_v54, -inf }
 0x237   :  { %532 = vmax.xlane.f32.xlu0 %v531_v56  ;;  %v794_v57 = vpop.f32.mrf.mxu1  ;;  %v832_v56 = vld [vmem:[#allocation2] sm:$0xff]  }
 0x2a8   :  { %v178_v58 = vpop.xlane.xlu0 %177 }
 0x2a9   :  { %v179_v59 = vsub.f32 %v174_v31, %v178_v58 }
 0x2ab   :  { %v180_v60 = vmul.f32 1.442695, %v179_v59 }
 0x2ad   :  { %833 = vpow2.f32 %v180_v60 }
 0x2b0   :  { %v294_v61 = vpop.xlane.xlu1 %293 }
 0x2b1   :  { %v295_v62 = vsub.f32 %v291_v38, %v294_v61 }
 0x2b3   :  { %v296_v63 = vmul.f32 1.442695, %v295_v62 }
 0x2b5   :  { %835 = vpow2.f32 %v296_v63 }
 0x2b8   :  { %v418_v3 = vpop.xlane.xlu0 %417 }
 0x2b9   :  { %v419_v16 = vsub.f32 %v415_v47, %v418_v3  ;;  %v831_v47 = vld [vmem:[#allocation2 + $0x8] sm:$0xff]  }
 0x2ba   :  { %v834_v1 = vpop.eup %833  ;;  %802 = vmatpush3.bf16.msra.mxu1 %v831_v47 }
 0x2bb   :  { %v182_v2 = vmul.f32 %v834_v1, %v173_v27  ;;  %v420_v17 = vmul.f32 1.442695, %v419_v16  ;;  %803 = vmatprep.subr.bf16.mxu1 %v918_v0 }
 0x2bd   :  { %v183_v4 = vsel %vm175_vm3, %v182_v2, 0.0 }
 0x2be   :  { %184 = vadd.xlane.f32.xlu1 %v183_v4  ;;  %804 = vmatpush3.bf16.msra.mxu1 %v832_v56 }
 0x2c0   :  { %v533_v5 = vpop.xlane.xlu0 %532 }
 0x2c1   :  { %v534_v6 = vsub.f32 %v530_v54, %v533_v5 }
 0x2c2   :  { %v836_v7 = vpop.eup %835 }
 0x2c3   :  { %v535_v9 = vmul.f32 1.442695, %v534_v6  ;;  %v298_v10 = vmul.f32 %v836_v7, %v173_v27 }
 0x2c5   :  { %837 = vpow2.f32 %v535_v9  ;;  %v299_v11 = vsel %vm175_vm3, %v298_v10, 0.0 }
 0x2c6   :  { %300 = vadd.xlane.f32.xlu0 %v299_v11  ;;  %839 = vpow2.f32 %v420_v17 }
 0x2cf   :  { %191 = vrot.lane.b32.xlu1 %v997_v8, %s922_s1 }
 0x2d2   :  { %v838_v13 = vpop.eup %837 }
 0x2d3   :  { %v537_v14 = vmul.f32 %v838_v13, %v414_v43  ;;  %v840_v18 = vpop.eup %839 }
 0x2d4   :  { %v422_v19 = vmul.f32 %v840_v18, %v414_v43 }
 0x2d5   :  { %v538_v15 = vsel %vm175_vm3, %v537_v14, 0.0 }
 0x2d6   :  { %539 = vadd.xlane.f32.xlu0 %v538_v15  ;;  %v423_v20 = vsel %vm175_vm3, %v422_v19, 0.0 }
 0x2ec   :  { %307 = vrot.lane.b32.xlu0 %v997_v8, %s923_s16 }
 0x2f3   :  { %424 = vadd.xlane.f32.xlu1 %v423_v20 }
 0x304   :  { %431 = vrot.lane.b32.xlu1 %v1001_v12, %s922_s1 }
 0x308   :  { %546 = vrot.lane.b32.xlu1 %v1001_v12, %s923_s16 }
 0x347   :  { %v185_v21 = vpop.xlane.xlu1 %184 }
 0x348   :  { %vm186_vm4 = vcmp.eq.f32.partialorder %v185_v21, 0.0 }
 0x349   :  { %v187_v22 = vsel %vm186_vm4, 1.0, %v185_v21 }
 0x34a   :  { %841 = vrcp.f32 %v187_v22 }
 0x34b   :  { %v192_v23 = vpop.permute.xlu1 %191 }
 0x34c   :  { %v198_v24 = vsel %vm196_vm5, %v192_v23, 0 }
 0x34d   :  { %760 = vmatpush3.bf16.msra.mxu0 %v198_v24 }
 0x34e   :  { %771 = vmatprep.subr.bf16.mxu0 %v918_v0 }
 0x34f   :  { %v301_v8 = vpop.xlane.xlu0 %300 }
 0x350   :  { %vm302_vm6 = vcmp.eq.f32.partialorder %v301_v8, 0.0 }
 0x351   :  { %v303_v25 = vsel %vm302_vm6, 1.0, %v301_v8 }
 0x352   :  { %843 = vrcp.f32 %v303_v25 }
 0x357   :  { %v842_v26 = vpop.eup %841 }
 0x358   :  { %v189_v27 = vmul.f32 %v842_v26, %v182_v2 }
 0x35a   :  { %v190_v28 = vpack.c.bf16 %v189_v27, %v189_v27  ;;  %599 = vst.msk [vmem:[#allocation6] sm:$0xff] %vm175_vm3, %v189_v27 }
 0x35c   :  { %762 = vmatmul.mubr.msk.bf16.vlgmr.msra.gmra.mxu0 %vm175_vm3, %v190_v28 }
 0x35d   :  { %773 = vmatprep.mubr.msk.bf16.mxu0 %vm919_vm0, %v918_v0 }
 0x35f   :  { %v844_v12 = vpop.eup %843  ;;  %v540_v29 = vpop.xlane.xlu0 %539 }
 0x360   :  { %vm541_vm7 = vcmp.eq.f32.partialorder %v540_v29, 0.0  ;;  %v305_v30 = vmul.f32 %v844_v12, %v298_v10 }
 0x361   :  { %v542_v31 = vsel %vm541_vm7, 1.0, %v540_v29 }
 0x362   :  { %845 = vrcp.f32 %v542_v31  ;;  %600 = vst.msk [vmem:[#allocation6 + $0x8] sm:$0xff] %vm175_vm3, %v305_v30  ;;  %v306_v34 = vpack.c.bf16 %v305_v30, %v305_v30 }
 0x363   :  { %v308_v32 = vpop.permute.xlu0 %307 }
 0x364   :  { %v313_v33 = vsel %vm196_vm5, %v308_v32, 0 }
 0x365   :  { %772 = vmatpush3.bf16.msra.mxu0 %v313_v33 }
 0x366   :  { %783 = vmatprep.subr.bf16.mxu0 %v918_v0 }
 0x368   :  { %774 = vmatmul.mubr.msk.bf16.vlgmr.msra.gmra.mxu0 %vm175_vm3, %v306_v34 }
 0x369   :  { %785 = vmatprep.mubr.msk.bf16.mxu0 %vm919_vm0, %v918_v0 }
 0x36f   :  { %v846_v35 = vpop.eup %845 }
 0x370   :  { %v544_v36 = vmul.f32 %v846_v35, %v537_v14 }
 0x372   :  { %602 = vst.msk [vmem:[#allocation6 + $0x18] sm:$0xff] %vm175_vm3, %v544_v36  ;;  %v545_v46 = vpack.c.bf16 %v544_v36, %v544_v36 }
 0x37c   :  { %v425_v37 = vpop.xlane.xlu1 %424 }
 0x37d   :  { %vm426_vm8 = vcmp.eq.f32.partialorder %v425_v37, 0.0 }
 0x37e   :  { %v427_v38 = vsel %vm426_vm8, 1.0, %v425_v37 }
 0x37f   :  { %847 = vrcp.f32 %v427_v38 }
 0x380   :  { %v432_v39 = vpop.permute.xlu1 %431 }
 0x381   :  { %v437_v40 = vsel %vm196_vm5, %v432_v39, 0 }
 0x382   :  { %784 = vmatpush3.bf16.msra.mxu0 %v437_v40 }
 0x383   :  { %795 = vmatprep.subr.bf16.mxu0 %v918_v0 }
 0x384   :  { %v547_v43 = vpop.permute.xlu1 %546 }
 0x385   :  { %v552_v45 = vsel %vm196_vm5, %v547_v43, 0 }
 0x38c   :  { %v848_v41 = vpop.eup %847 }
 0x38d   :  { %v429_v42 = vmul.f32 %v848_v41, %v422_v19 }
 0x38f   :  { %v430_v44 = vpack.c.bf16 %v429_v42, %v429_v42  ;;  %601 = vst.msk [vmem:[#allocation6 + $0x10] sm:$0xff] %vm175_vm3, %v429_v42 }
 0x391   :  { %786 = vmatmul.mubr.msk.bf16.vlgmr.msra.gmra.mxu0 %vm175_vm3, %v430_v44 }
 0x392   :  { %796 = vmatpush3.bf16.msra.mxu0 %v552_v45  ;;  %797 = vmatprep.mubr.msk.bf16.mxu0 %vm919_vm0, %v918_v0 }
 0x399   :  { %798 = vmatmul.mubr.msk.bf16.vlgmr.msra.gmra.mxu0 %vm175_vm3, %v545_v46 }
 0x41c   :  { %v234_v48 = vpop.f32.mrf.mxu0 }
 0x41e   :  { %v763_v49 = vpop.f32.mrf.mxu0 }
 0x420   :  { %v237_v50 = vpop.f32.mrf.mxu0 }
 0x422   :  { %v764_v51 = vpop.f32.mrf.mxu0 }
 0x428   :  { %v349_v52 = vpop.f32.mrf.mxu0 }
 0x42a   :  { %v775_v53 = vpop.f32.mrf.mxu0 }
 0x42c   :  { %v352_v54 = vpop.f32.mrf.mxu0 }
 0x42e   :  { %v776_v55 = vpop.f32.mrf.mxu0 }
 0x451   :  { %v473_v57 = vpop.f32.mrf.mxu0 }
 0x453   :  { %v787_v58 = vpop.f32.mrf.mxu0 }
 0x455   :  { %v476_v59 = vpop.f32.mrf.mxu0 }
 0x457   :  { %v788_v60 = vpop.f32.mrf.mxu0 }
 0x459   :  { %v588_v61 = vpop.f32.mrf.mxu0 }
 0x45a   :  { %v823_v62 = vpack.i.bf16 %v588_v61, %v349_v52 }
 0x45b   :  { %v799_v63 = vpop.f32.mrf.mxu0 }
 0x45c   :  { %824 = vrot.lane.b32.xlu0 %v823_v62, %s924_s17 }
 0x45d   :  { %v591_v0 = vpop.f32.mrf.mxu0 }
 0x45f   :  { %v800_v1 = vpop.f32.mrf.mxu0 }
 0x4ce   :  { %v825_v2 = vpop.permute.xlu0 %824 }
 0x4cf   :  { %v827_v3 = vunpack.i.h.bf16 %v825_v2  ;;  %v826_v4 = vunpack.i.l.bf16 %v825_v2 }
 0x4d1   :  { %v598_v5 = vsel %vm122_vm2, %v473_v57, %v827_v3  ;;  %v359_v6 = vsel %vm122_vm2, %v234_v48, %v826_v4 }
 0x4d2   :  { %v603_v7 = vpack.c.bf16 %v598_v5, %v359_v6 }
 0x4d4   :  { %806 = vmatmul.mubr.msk.bf16.vlgmr.msra.gmra.mxu1 %vm72_vm1, %v603_v7 }
 0x4d5   :  { %880 = shalt.err (!%p877_p9)
}
 0x4d6   :  { %s926_s21 = smov 128   ;;  %s927_s22 = smov 8   ;;  %v719_v9 = vld [vmem:[%s1087_s5] ss:$0 sm:$0xff] }
 0x4d7   :  { %696 = dma.vmem_to_hbm [thread:$0]  %s691_s19, 512, %s1089_s7, [#allocation7], %s926_s21, %s926_s21, %s927_s22  }
 0x4d8   :  { %s928_s27 = smov [#allocation5]  }
 0x4d9   :  { %s678_s28 = sshll.u32 %s928_s27, 4  ;;  %s679_s28 = int_to_ptr.vmem [resolvable:$true] %s678_s28 }
 0x4da   :  { %s889_s29 = scalar_lea.vmem %s679_s28, 256  ;;  %p894_p11 = scmp.lt.s32.totalorder %s679_s28, %s679_s28 }
 0x4db   :  { %p890_p10 = scmp.ne.s32.totalorder %s679_s28, %s889_s29  ;;  %p895_p12 = scmp.lt.s32.totalorder %s889_s29, %s889_s29 }
 0x4dd   :  { %p896_p13 = por %p895_p12, %p894_p11 }
 0x4df   :  { %p897_p0 = pnand %p896_p13, %p890_p10 }
 0x594   :  { %v664_v10 = vpop.f32.mrf.mxu1 }
 0x595   :  { %v665_v11 = vadd.f32 %v719_v9, %v664_v10 }
 0x596   :  { %v807_v13 = vpop.f32.mrf.mxu1 }
 0x597   :  { %671 = vst.msk [vmem:[#allocation5] sm:$0xff] %vm72_vm1, %v665_v11 }
 0x598   :  { %v667_v14 = vpop.f32.mrf.mxu1 }
 0x599   :  { %v668_v15 = vadd.f32 %v719_v9, %v667_v14 }
 0x59a   :  { %v808_v16 = vpop.f32.mrf.mxu1 }
 0x59b   :  { %672 = vst.msk [vmem:[#allocation5 + $0x8] sm:$0xff] %vm72_vm1, %v668_v15 }
 0x59c   :  { %900 = shalt.err (!%p897_p0)
}
 0x59d   :  { %684 = dma.vmem_to_hbm [thread:$0]  %s679_s28, 256, %s1088_s6, [#allocation4], %s926_s21, %s926_s21, %s927_s22  }
 0x59e   :  { %911 = dma.done.wait [#allocation4], 256  }
 0x59f   :  { %912 = vsyncadd [#allocation4], 4294967040 }
 0x5a0   :  { %913 = dma.done.wait [#allocation7], 512  }
 0x5a1   :  { %914 = vsyncadd [#allocation7], 4294966784 }
 0x5a2   :  { %703 = vsyncpa [#allocation3], 1 }
 0x5a3   :  { %704 = vsyncpa [#allocation4], 1 }
 0x5a4   :  { %705 = vsyncpa [#allocation7], 1 }

</bundles_post_ra>
